<compile_context>
chip_gen: v7x
topology: tpu7x:2x2x1
jax: 0.10.0
libtpu: 0.0.40
codegen_flags: <defaults>
</compile_context>

<pallas_src>
import functools

import jax
import jax.numpy as jnp
from jax import lax
from jax.experimental import pallas as pl
from jax.experimental.pallas import tpu as pltpu


def _round_up(x, m):
    return ((x + m - 1) // m) * m


def _focal_ce_kernel(x_ref, t_ref, ce_ref, m_scr, l_scr, p_scr, *, n_valid):
    """One (row_tile, class_tile) step of the streaming per-row cross entropy."""
    i = pl.program_id(0)           # row-tile index   ("parallel")
    j = pl.program_id(1)           # class-tile index ("arbitrary", innermost)
    nj = pl.num_programs(1)

    x = x_ref[...].astype(jnp.float32)        # (tr, tc) logits tile, f32 math
    t = t_ref[...]                            # (tr, 1)  int32 targets
    tr, tc = x.shape

    @pl.when(j == 0)
    def _():
        m_scr[...] = jnp.full_like(m_scr, jnp.finfo(jnp.float32).min)
        l_scr[...] = jnp.zeros_like(l_scr)
        p_scr[...] = jnp.zeros_like(p_scr)

    # ---- online logsumexp update (running max m, running sum l) ------------
    m_old = m_scr[...]
    m_new = jnp.maximum(m_old, jnp.max(x, axis=-1, keepdims=True))
    alpha = jnp.exp(m_old - m_new)
    l_scr[...] = alpha * l_scr[...] + jnp.sum(
        jnp.exp(x - m_new), axis=-1, keepdims=True)
    m_scr[...] = m_new

    # ---- accumulate the target-class logit (bool select, no f32 multiply) --
    lane = lax.broadcasted_iota(jnp.int32, (tr, tc), 1) + j * tc
    p_scr[...] += jnp.sum(jnp.where(lane == t, x, 0.0), axis=-1, keepdims=True)

    # ---- finalize per-row CE on the last class tile -------------------------
    @pl.when(j == nj - 1)
    def _():
        ce = m_scr[...] + jnp.log(l_scr[...]) - p_scr[...]          # (tr, 1)
        row = lax.broadcasted_iota(jnp.int32, (tr, 1), 0) + i * tr
        ce_ref[...] = jnp.where(row < n_valid, ce, 0.0)             # mask pad rows


def focal_loss(logits, targets, gamma=2, *, row_tile=None, class_tile=None):
    """logits: (N, C) float32/bfloat16; targets: (N,) int. Returns scalar f32 loss."""
    n, c = logits.shape
    sub = 16 if logits.dtype == jnp.bfloat16 else 8

    # Tile selection: lane-dense class tiles (multiple of 128), row tiles a
    # multiple of the sublane packing.  Caps keep the double-buffered logits
    # block at ~8 MiB or less (v7x-safe); raise freely on v5e/v6e if desired.
    if class_tile is None:
        class_tile = min(_round_up(c, 128), 2048)
    class_tile = _round_up(class_tile, 128)
    if row_tile is None:
        row_tile = min(_round_up(n, sub), 512)
    row_tile = _round_up(row_tile, sub)

    n_pad = _round_up(n, row_tile)
    c_pad = _round_up(c, class_tile)

    x = logits
    if (n_pad, c_pad) != (n, c):
        # Pad with a large negative logit: contributes ~0 to the softmax
        # denominator and never matches a valid (< C) target index.
        x = jnp.pad(x, ((0, n_pad - n), (0, c_pad - c)), constant_values=-1e30)
    t = targets.astype(jnp.int32).reshape(n, 1)
    if n_pad != n:
        t = jnp.pad(t, ((0, n_pad - n), (0, 0)))

    grid = (n_pad // row_tile, c_pad // class_tile)

    block_bytes = row_tile * class_tile * x.dtype.itemsize
    vmem_limit = int(min(max(2 * block_bytes + (2 << 20), 16 << 20), 64 << 20))

    ce = pl.pallas_call(
        functools.partial(_focal_ce_kernel, n_valid=n),
        out_shape=jax.ShapeDtypeStruct((n_pad, 1), jnp.float32),
        grid_spec=pltpu.PrefetchScalarGridSpec(
            num_scalar_prefetch=0,
            grid=grid,
            in_specs=[
                pl.BlockSpec((row_tile, class_tile), lambda i, j: (i, j)),
                pl.BlockSpec((row_tile, 1), lambda i, j: (i, 0)),
            ],
            out_specs=pl.BlockSpec((row_tile, 1), lambda i, j: (i, 0)),
            scratch_shapes=[
                pltpu.VMEM((row_tile, 1), jnp.float32),   # running max m
                pltpu.VMEM((row_tile, 1), jnp.float32),   # running sum l
                pltpu.VMEM((row_tile, 1), jnp.float32),   # gathered target logit
            ],
        ),
        compiler_params=pltpu.CompilerParams(
            dimension_semantics=("parallel", "arbitrary"),
            vmem_limit_bytes=vmem_limit,
        ),
    )(x, t)

    # Tiny scalar tail in plain JAX (keeps the row grid axis "parallel").
    # NOTE: focal modulation is applied to the batch-MEAN CE, exactly like the
    # PyTorch module (NOT per-sample focal loss).
    logp = jnp.mean(ce[:n, 0])
    p = jnp.exp(-logp)
    one_minus_p = 1.0 - p
    if isinstance(gamma, int):
        mod = lax.integer_pow(one_minus_p, gamma)   # plain VPU mults, no pow
    else:
        # Guard: 1-p can round to a tiny negative; clamp before a real pow.
        mod = jnp.power(jnp.maximum(one_minus_p, 0.0), gamma)
    return mod * logp


def focal_loss_ref(logits, targets, gamma=2):
    """Pure-JAX reference matching torch.nn.CrossEntropyLoss + focal wrap."""
    logits = logits.astype(jnp.float32)
    lse = jax.nn.logsumexp(logits, axis=-1)
    picked = jnp.take_along_axis(
        logits, targets[:, None].astype(jnp.int32), axis=-1)[:, 0]
    logp = jnp.mean(lse - picked)          # CrossEntropyLoss(reduction='mean')
    p = jnp.exp(-logp)
    return (1.0 - p) ** gamma * logp


if __name__ == "__main__":
    key = jax.random.PRNGKey(0)
    kx, kt = jax.random.split(key)

    # Small but non-trivial: exercises 3 row tiles x 3 class tiles including
    # row (20 -> 24) and class (300 -> 384) padding paths.
    N, C = 20, 300
    logits = jax.random.normal(kx, (N, C), jnp.float32)
    targets = jax.random.randint(kt, (N,), 0, C, dtype=jnp.int32)

    out = focal_loss(logits, targets, gamma=2, row_tile=8, class_tile=128)
    out = jax.block_until_ready(out)

    ref = focal_loss_ref(logits, targets, gamma=2)
    err = float(jnp.abs(out - ref))
    assert jnp.allclose(out, ref, atol=1e-5, rtol=1e-5), (
        f"err={err} out={float(out)} ref={float(ref)}")

    print("KERNEL_OK")
</pallas_src>

<mosaic_0001>
module attributes {stable_mosaic.version = 11 : i64} {
  func.func @_focal_ce_kernel(%arg0: i32, %arg1: i32, %arg2: memref<8x128xf32, #tpu.memory_space<vmem>>, %arg3: memref<8x1xi32, #tpu.memory_space<vmem>>, %arg4: memref<8x1xf32, #tpu.memory_space<vmem>>, %arg5: memref<8x1xf32, #tpu.memory_space<vmem>>, %arg6: memref<8x1xf32, #tpu.memory_space<vmem>>, %arg7: memref<8x1xf32, #tpu.memory_space<vmem>>) attributes {dimension_semantics = [#tpu.dimension_semantics<parallel>, #tpu.dimension_semantics<arbitrary>], iteration_bounds = array<i64: 3, 3>, scalar_prefetch = 0 : i64, scratch_operands = 3 : i64, tpu.core_type = #tpu.core_type<tc>, window_params = [{transform_indices = @transform_0, window_bounds = array<i64: 8, 128>}, {transform_indices = @transform_1, window_bounds = array<i64: 8, 1>}, {transform_indices = @transform_2, window_bounds = array<i64: 8, 1>}]} {
    %c0 = arith.constant 0 : index
    %c0_0 = arith.constant 0 : index
    %0 = vector.load %arg2[%c0, %c0_0] : memref<8x128xf32, #tpu.memory_space<vmem>>, vector<8x128xf32>
    %c0_1 = arith.constant 0 : index
    %c0_2 = arith.constant 0 : index
    %1 = vector.load %arg3[%c0_1, %c0_2] : memref<8x1xi32, #tpu.memory_space<vmem>>, vector<8x1xi32>
    %c0_i32 = arith.constant 0 : i32
    %2 = arith.cmpi eq, %arg1, %c0_i32 : i32
    %3 = arith.extui %2 : i1 to i32
    %c0_i32_3 = arith.constant 0 : i32
    %4 = arith.cmpi ne, %3, %c0_i32_3 : i32
    scf.if %4 {
      %cst_20 = arith.constant -3.40282347E+38 : f32
      %37 = vector.broadcast %cst_20 : f32 to vector<8x1xf32>
      %c0_21 = arith.constant 0 : index
      %c0_22 = arith.constant 0 : index
      %38 = vector.load %arg5[%c0_21, %c0_22] : memref<8x1xf32, #tpu.memory_space<vmem>>, vector<8x1xf32>
      tpu.vector_store %arg5[%c0_21, %c0_22], %37 {strides = array<i32>} : memref<8x1xf32, #tpu.memory_space<vmem>>, vector<8x1xf32>,
      %cst_23 = arith.constant 0.000000e+00 : f32
      %39 = vector.broadcast %cst_23 : f32 to vector<8x1xf32>
      %c0_24 = arith.constant 0 : index
      %c0_25 = arith.constant 0 : index
      %40 = vector.load %arg6[%c0_24, %c0_25] : memref<8x1xf32, #tpu.memory_space<vmem>>, vector<8x1xf32>
      tpu.vector_store %arg6[%c0_24, %c0_25], %39 {strides = array<i32>} : memref<8x1xf32, #tpu.memory_space<vmem>>, vector<8x1xf32>,
      %cst_26 = arith.constant 0.000000e+00 : f32
      %41 = vector.broadcast %cst_26 : f32 to vector<8x1xf32>
      %c0_27 = arith.constant 0 : index
      %c0_28 = arith.constant 0 : index
      %42 = vector.load %arg7[%c0_27, %c0_28] : memref<8x1xf32, #tpu.memory_space<vmem>>, vector<8x1xf32>
      tpu.vector_store %arg7[%c0_27, %c0_28], %41 {strides = array<i32>} : memref<8x1xf32, #tpu.memory_space<vmem>>, vector<8x1xf32>,
    } else {
    }
    %c0_4 = arith.constant 0 : index
    %c0_5 = arith.constant 0 : index
    %5 = vector.load %arg5[%c0_4, %c0_5] : memref<8x1xf32, #tpu.memory_space<vmem>>, vector<8x1xf32>
    %cst = arith.constant dense<0xFF800000> : vector<8xf32>
    %6 = vector.multi_reduction <maximumf>, %0, %cst [1] : vector<8x128xf32> to vector<8xf32>
    %7 = vector.shape_cast %6 : vector<8xf32> to vector<8x1xf32>
    %8 = arith.maximumf %5, %7 : vector<8x1xf32>
    %9 = arith.subf %5, %8 : vector<8x1xf32>
    %10 = math.exp %9 : vector<8x1xf32>
    %c0_6 = arith.constant 0 : index
    %c0_7 = arith.constant 0 : index
    %11 = vector.load %arg6[%c0_6, %c0_7] : memref<8x1xf32, #tpu.memory_space<vmem>>, vector<8x1xf32>
    %12 = arith.mulf %10, %11 : vector<8x1xf32>
    %13 = vector.broadcast %8 : vector<8x1xf32> to vector<8x128xf32>
    %14 = arith.subf %0, %13 : vector<8x128xf32>
    %15 = math.exp %14 : vector<8x128xf32>
    %cst_8 = arith.constant dense<0.000000e+00> : vector<8xf32>
    %16 = vector.multi_reduction <add>, %15, %cst_8 [1] : vector<8x128xf32> to vector<8xf32>
    %17 = vector.shape_cast %16 : vector<8xf32> to vector<8x1xf32>
    %18 = arith.addf %12, %17 : vector<8x1xf32>
    %c0_9 = arith.constant 0 : index
    %c0_10 = arith.constant 0 : index
    %19 = vector.load %arg6[%c0_9, %c0_10] : memref<8x1xf32, #tpu.memory_space<vmem>>, vector<8x1xf32>
    tpu.vector_store %arg6[%c0_9, %c0_10], %18 {strides = array<i32>} : memref<8x1xf32, #tpu.memory_space<vmem>>, vector<8x1xf32>,
    %c0_11 = arith.constant 0 : index
    %c0_12 = arith.constant 0 : index
    %20 = vector.load %arg5[%c0_11, %c0_12] : memref<8x1xf32, #tpu.memory_space<vmem>>, vector<8x1xf32>
    tpu.vector_store %arg5[%c0_11, %c0_12], %8 {strides = array<i32>} : memref<8x1xf32, #tpu.memory_space<vmem>>, vector<8x1xf32>,
    %21 = tpu.iota {dimensions = array<i32: 1>} : vector<8x128xi32>
    %c128_i32 = arith.constant 128 : i32
    %22 = arith.muli %arg1, %c128_i32 : i32
    %23 = vector.broadcast %22 : i32 to vector<8x128xi32>
    %24 = arith.addi %21, %23 : vector<8x128xi32>
    %c0_13 = arith.constant 0 : index
    %c0_14 = arith.constant 0 : index
    %25 = vector.load %arg7[%c0_13, %c0_14] : memref<8x1xf32, #tpu.memory_space<vmem>>, vector<8x1xf32>
    %26 = vector.broadcast %1 : vector<8x1xi32> to vector<8x128xi32>
    %27 = arith.cmpi eq, %24, %26 : vector<8x128xi32>
    %cst_15 = arith.constant 0.000000e+00 : f32
    %28 = vector.broadcast %cst_15 : f32 to vector<8x128xf32>
    %29 = arith.select %27, %0, %28 : vector<8x128xi1>, vector<8x128xf32>
    %cst_16 = arith.constant dense<0.000000e+00> : vector<8xf32>
    %30 = vector.multi_reduction <add>, %29, %cst_16 [1] : vector<8x128xf32> to vector<8xf32>
    %31 = vector.shape_cast %30 : vector<8xf32> to vector<8x1xf32>
    %32 = arith.addf %25, %31 : vector<8x1xf32>
    %c0_17 = arith.constant 0 : index
    %c0_18 = arith.constant 0 : index
    %33 = vector.load %arg7[%c0_17, %c0_18] : memref<8x1xf32, #tpu.memory_space<vmem>>, vector<8x1xf32>
    tpu.vector_store %arg7[%c0_17, %c0_18], %32 {strides = array<i32>} : memref<8x1xf32, #tpu.memory_space<vmem>>, vector<8x1xf32>,
    %c2_i32 = arith.constant 2 : i32
    %34 = arith.cmpi eq, %arg1, %c2_i32 : i32
    %35 = arith.extui %34 : i1 to i32
    %c0_i32_19 = arith.constant 0 : i32
    %36 = arith.cmpi ne, %35, %c0_i32_19 : i32
    scf.if %36 {
      %c0_20 = arith.constant 0 : index
      %c0_21 = arith.constant 0 : index
      %37 = vector.load %arg5[%c0_20, %c0_21] : memref<8x1xf32, #tpu.memory_space<vmem>>, vector<8x1xf32>
      %c0_22 = arith.constant 0 : index
      %c0_23 = arith.constant 0 : index
      %38 = vector.load %arg6[%c0_22, %c0_23] : memref<8x1xf32, #tpu.memory_space<vmem>>, vector<8x1xf32>
      %39 = math.log %38 : vector<8x1xf32>
      %40 = arith.addf %37, %39 : vector<8x1xf32>
      %c0_24 = arith.constant 0 : index
      %c0_25 = arith.constant 0 : index
      %41 = vector.load %arg7[%c0_24, %c0_25] : memref<8x1xf32, #tpu.memory_space<vmem>>, vector<8x1xf32>
      %42 = arith.subf %40, %41 : vector<8x1xf32>
      %43 = tpu.iota {dimensions = array<i32: 0>} : vector<8x1xi32>
      %c8_i32 = arith.constant 8 : i32
      %44 = arith.muli %arg0, %c8_i32 : i32
      %45 = vector.broadcast %44 : i32 to vector<8x1xi32>
      %46 = arith.addi %43, %45 : vector<8x1xi32>
      %c20_i32 = arith.constant 20 : i32
      %47 = vector.broadcast %c20_i32 : i32 to vector<8x1xi32>
      %48 = arith.cmpi slt, %46, %47 : vector<8x1xi32>
      %cst_26 = arith.constant 0.000000e+00 : f32
      %49 = vector.broadcast %cst_26 : f32 to vector<8x1xf32>
      %50 = arith.select %48, %42, %49 : vector<8x1xi1>, vector<8x1xf32>
      %c0_27 = arith.constant 0 : index
      %c0_28 = arith.constant 0 : index
      %51 = vector.load %arg4[%c0_27, %c0_28] : memref<8x1xf32, #tpu.memory_space<vmem>>, vector<8x1xf32>
      tpu.vector_store %arg4[%c0_27, %c0_28], %50 {strides = array<i32>} : memref<8x1xf32, #tpu.memory_space<vmem>>, vector<8x1xf32>,
    } else {
    }
    return
  }
  func.func @transform_0(%arg0: i32, %arg1: i32) -> (i32, i32) {
    %c0_i32 = arith.constant 0 : i32
    return %arg0, %arg1 : i32, i32
  }
  func.func @transform_1(%arg0: i32, %arg1: i32) -> (i32, i32) {
    %c0_i32 = arith.constant 0 : i32
    %c0_i32_0 = arith.constant 0 : i32
    return %arg0, %c0_i32 : i32, i32
  }
  func.func @transform_2(%arg0: i32, %arg1: i32) -> (i32, i32) {
    %c0_i32 = arith.constant 0 : i32
    %c0_i32_0 = arith.constant 0 : i32
    return %arg0, %c0_i32 : i32, i32
  }
}

</mosaic_0001>

<bundles_post_ra>
// kernel: tpu_custom_call.1
= control target key start
LH: loop header
LB: loop body
LE: loop exit
PB: predicated region body
PF: predicated region fallthrough
CT: control target
= control target key end

     0   :  { %7 = vsyncpa [#allocation6], 0  ;;  %s729_s0 = inlined_call_operand.hbm [shape: f32[24,384], index: 0, kind: input, shape index: {}]   ;;  %s730_s1 = inlined_call_operand.vmem [shape: s32[24,1], index: 1, kind: input, shape index: {}]   ;;  %s731_s2 = inlined_call_operand.vmem [shape: f32[24,1], index: 2, kind: output, shape index: {}]  }
   0x1   :  { %9 = vsyncpa [#allocation6 + $0x1], 0  ;;  %s565_s9 = smov 0   ;;  %s567_s10 = smov 0  }
   0x2   :  { %s569_s11 = smov 0   ;;  %s571_s12 = smov 0  }
   0x3   :  { %s573_s13 = smov 0   ;;  %s575_s14 = smov 0  }
   0x4   :  { %s577_s15 = smov 0   ;;  %s579_s16 = smov 0  }
   0x5 LB: > { %s349_s17 = sadd.s32 4294967295, %s544_s16   ;;  %s24_s18 = sadd.s32 1, %s536_s14  ;;  %s544_s16 = sphi %s579_s16, %s15_s16   ;;  %s540_s15 = sphi %s577_s15, %s743_s15   ;;  %s536_s14 = sphi %s575_s14, %s742_s14   ;;  %s532_s13 = sphi %s573_s13, %s741_s13   ;;  %s528_s12 = sphi %s571_s12, %s740_s12   ;;  %s524_s11 = sphi %s569_s11, %s739_s11   ;;  %s520_s10 = sphi %s567_s10, %s738_s10   ;;  %s516_s9 = sphi %s565_s9, %s737_s9  }
   0x6   : > { %p25_p0 = scmp.ge.s32.totalorder %s24_s18, 3  ;;  %s27_s19 = sadd.s32 1, %s540_s15 }
   0x7   : > { %s36_s20 = sadd.s32 1, %s524_s11  ;;  %p43_p1 = scmp.ne.s32.totalorder %s524_s11, %s520_s10 }
   0x8   : > { %s745_s18 = smov (%p25_p0, %s24_s18), 0  ;;  %s747_s19 = smov (!%p25_p0, %s27_s19), %s540_s15 }
   0x9   : > { %s32_s21 = ssub.s32 %s536_s14, %s745_s18  ;;  %p44_p2 = scmp.eq.s32.totalorder %s544_s16, 0 }
   0xa   : > { %p29_p3 = scmp.ge.s32.totalorder %s747_s19, 3  ;;  %p49_p4 = scmp.ne.s32.totalorder %s520_s10, %s516_s9 }
   0xb   : > { %p616_p5 = por %p44_p2, %p43_p1  ;;  %p50_p6 = scmp.eq.s32.totalorder %s349_s17, 0 }
   0xc   : > { %s749_s19 = smov (%p29_p3, %s747_s19), 0  ;;  %p372_p8 = scmp.lt.s32.totalorder %s544_s16, 9 }
   0xd   : > { %p622_p7 = por %p50_p6, %p49_p4  ;;  %s31_s24 = ssub.s32 %s540_s15, %s749_s19 }
   0xe   : > { %s33_s25 = sor.u32 %s32_s21, %s31_s24  ;;  %s125_s26 = sand.u32 1, %s524_s11  }
   0xf   : > { %p34_p9 = scmp.eq.s32.totalorder %s33_s25, 0  ;;  %s353_s27 = sshll.u32 %s125_s26, 3 }
  0x10   : > { %s365_s28 = smul.u32 3, %s540_s15  ;;  %s129_s4 = scalar_lea.vmem [#allocation5], %s353_s27 }
  0x11   : > { %s632_s29 = scalar_select %p34_p9, %s524_s11, %s36_s20  }
  0x12   : > { %s134_s30 = sadd.s32 %s536_s14, %s365_s28  ;;  %s138_s5 = sshll.u32 %s129_s4, 4  ;;  %s640_s5 = int_to_ptr.vmem [resolvable:$true] %s138_s5 }
  0x13   : > { %s354_s3 = sshll.u32 %s134_s30, 7  ;;  %p646_p10 = pnand %p372_p8, %p616_p5 }
  0x14   : > { %s638_s8 = scalar_lea.hbm %s729_s0, %s354_s3  ;;  %s126_s17 = scalar_lea.sflag [#allocation6], %s125_s26 }
  0x15   : > { %s448_s20 = scalar_lea.hbm %s638_s8, 128  ;;  %p450_p0 = pneg %p646_p10 }
  0x16   : > { %p449_p13 = scmp.ne.s32.totalorder %s638_s8, %s448_s20  ;;  %s453_s24 = scalar_lea.hbm %s729_s0, 1152 }
  0x17   : > { %p454_p3 = scmp.lt.u32.totalorder %s638_s8, %s729_s0  ;;  %p455_p4 = scmp.lt.u32.totalorder %s453_s24, %s448_s20 }
  0x18   : > { %p451_p1 = pnand %p450_p0, %p449_p13  ;;  %p457_p6 = scmp.lt.u32.totalorder %s448_s20, %s638_s8 }
  0x19   : > { %p456_p5 = por %p455_p4, %p454_p3 }
  0x1a   : > { %p452_p2 = pneg %p451_p1 }
  0x1b   : > { %p458_p8 = por %p457_p6, %p456_p5 }
  0x1d   : > { %p459_p9 = pnand %p458_p8, %p452_p2 }
  0x1f   : > { %462 = shalt.err (!%p459_p9)
}
  0x20   : > { %s463_s26 = scalar_lea.vmem %s640_s5, 128  ;;  %s546_s28 = smov [#allocation5]  }
  0x21   : > { %p464_p13 = scmp.ne.s32.totalorder %s640_s5, %s463_s26  ;;  %s468_s30 = sshll.u32 %s546_s28, 4  ;;  %s469_s30 = int_to_ptr.vmem [resolvable:$false] %s468_s30 }
  0x22   : > { %s470_s3 = scalar_lea.vmem %s469_s30, 256  ;;  %p471_p12 = scmp.lt.s32.totalorder %s640_s5, %s469_s30 }
  0x23   : > { %p466_p1 = pnand %p464_p13, %p450_p0  ;;  %p472_p3 = scmp.lt.s32.totalorder %s470_s3, %s463_s26 }
  0x25   : > { %p467_p11 = pneg %p466_p1  ;;  %p473_p4 = por %p472_p3, %p471_p12 }
  0x27   : > { %p474_p5 = pnand %p473_p4, %p467_p11 }
  0x29   : > { %477 = shalt.err (!%p474_p5)
}
  0x2a   : > { %371 = dma.hbm_to_vmem [thread:$0]  (!%p646_p10), %s638_s8, 128, %s640_s5, %s126_s17  }
  0x2b   : > { %p735_p2 = scmp.lt.s32.totalorder %s544_s16, 10  ;;  %p736_p6 = scmp.ge.s32.totalorder %s544_s16, 1 }
  0x2d   : > { %p151_p0 = pnand %p736_p6, %p735_p2 }
  0x2e   : > { %s156_s4 = sand.u32 (!%p151_p0), 1, %s520_s10  }
  0x2f   : > { %154 = sbr.rel (%p151_p0) target bundleno = 523 (0x20b), region = 28  ;;  %s356_s6 = sshll.u32 (!%p151_p0), %s156_s4, 3 }
  0x30   : > { %s157_s7 = scalar_lea.sflag (!%p151_p0), [#allocation6], %s156_s4  ;;  %s160_s20 = scalar_lea.vmem (!%p151_p0), [#allocation5], %s356_s6 }
  0x36   : > { %511 = dma.done.wait (%p622_p7), %s157_s7, 128  }
  0x37   : > { %513 = vsyncadd (%p622_p7), %s157_s7, 4294967168  ;;  %p184_p11 = scmp.lt.s32.totalorder %s532_s13, 2  ;;  %v192_v0 = vld [vmem:[%s160_s20] sm:$0xff]  ;;  %p359_p10 = scmp.ne.s32.totalorder %s528_s12, 0 }
  0x38   : > { %vm198_vm0 = vcmask (!%p359_p10), 7168   ;;  %v547_v2 = vmov (!%p359_p10), -3.4028235e+38   ;;  %v548_v3 = vmov (!%p359_p10), 0.0  }
  0x39   : > { %s185_s9 = scalar_select %p184_p11, %s532_s13, 2 }
  0x3a   : > { %197 = sbr.rel (%p359_p10) target bundleno = 65 (0x41), region = 36  ;;  %199 = vst.msk [vmem:[#allocation2] sm:$0xff] (!%p359_p10), %vm198_vm0, %v547_v2  ;;  %200 = vst.msk [vmem:[#allocation3] sm:$0xff] (!%p359_p10), %vm198_vm0, %v548_v3 }
  0x3b   : > { %s357_s5 = sshll.u32 %s185_s9, 3  ;;  %201 = vst.msk [vmem:[#allocation4] sm:$0xff] (!%p359_p10), %vm198_vm0, %v548_v3 }
  0x3c   : > { %s187_s21 = scalar_lea.vmem %s730_s1, %s357_s5  ;;  %s694_s25 = scalar_lea.vmem %s731_s2, %s357_s5 }
  0x3d   : > { %v193_v1 = vld [vmem:[%s187_s21] sm:$0xff] }
  0x41 PF: > { %203 = vmax.xlane.f32.xlu0 %v192_v0  ;;  %v549_v4 = vmov 0   ;;  %v202_v5 = vld [vmem:[#allocation2] sm:$0xff]  ;;  %vm222_vm1 = vcmask 7168   ;;  %v225_v11 = vlaneseq  ;;  %s360_s23 = sshll.u32 %s528_s12, 7  ;;  %v209_v21 = vld [vmem:[#allocation3] sm:$0xff]  ;;  %p361_p7 = scmp.ne.s32.totalorder %s528_s12, 2 }
  0x42   : > { %440 = vset.pattern.permute.xlu0 %v549_v4  ;;  %441 = vset.pattern.permute.xlu1 %v549_v4  ;;  %v228_v14 = vstv %s360_s23  ;;  %v230_v25 = vld [vmem:[#allocation4] sm:$0xff]  ;;  %s362_s27 = sshll.u32 (!%p361_p7), %s532_s13, 3 }
  0x43   : > { %232 = vperm.xlu1 %441, %v193_v1   ;;  %v226_v13 = vand.u32 127, %v225_v11  ;;  %v252_v29 = vshrl.u32 (!%p361_p7), %v225_v11, 7  ;;  %v254_v30 = vstv (!%p361_p7), %s362_s27 }
  0x45   : > { %v229_v15 = vadd.s32 %v228_v14, %v226_v13  ;;  %v255_v33 = vadd.s32 (!%p361_p7), %v254_v30, %v252_v29 }
  0x47   : > { %vm256_vm3 = vcmp.lt.s32.totalorder (!%p361_p7), %v255_v33, 20 }
  0xc2   : > { %v233_v16 = vpop.permute.xlu1 %232 }
  0xc3   : > { %vm234_vm2 = vcmp.eq.s32.totalorder %v229_v15, %v233_v16 }
  0xc4   : > { %v235_v18 = vsel %vm234_vm2, %v192_v0, 0.0 }
  0xce   : > { %v204_v6 = vpop.xlane.xlu0 %203 }
  0xcf   : > { %v205_v7 = vmax.f32 %v202_v5, %v204_v6 }
  0xd1   : > { %v206_v8 = vsub.f32 %v202_v5, %v205_v7  ;;  %224 = vst.msk [vmem:[#allocation2] sm:$0xff] %vm222_vm1, %v205_v7  ;;  %213 = vperm.xlu0 %440, %v205_v7  }
  0xd3   : > { %v207_v19 = vmul.f32 1.442695, %v206_v8 }
  0xd8   : > { %v244_v32 = vld [vmem:[#allocation2] sm:$0xff] (!%p361_p7) }
 0x150   : > { %v214_v9 = vpop.permute.xlu0 %213 }
 0x151   : > { %v216_v10 = vsub.f32 %v192_v0, %v214_v9 }
 0x153   : > { %v217_v12 = vmul.f32 1.442695, %v216_v10 }
 0x155   : > { %442 = vpow2.f32 %v217_v12 }
 0x156   : > { %444 = vpow2.f32 %v207_v19 }
 0x15f   : > { %v443_v17 = vpop.eup %442 }
 0x160   : > { %219 = vadd.xlane.f32.xlu1 %v443_v17  ;;  %v445_v20 = vpop.eup %444 }
 0x161   : > { %v210_v22 = vmul.f32 %v445_v20, %v209_v21 }
 0x164   : > { %236 = vadd.xlane.f32.xlu1 %v235_v18 }
 0x1ed   : > { %v220_v23 = vpop.xlane.xlu1 %219 }
 0x1ee   : > { %v221_v24 = vadd.f32 %v220_v23, %v210_v22  ;;  %243 = sbr.rel (%p361_p7) target bundleno = 523 (0x20b), region = 40 }
 0x1f0   : > { %223 = vst.msk [vmem:[#allocation3] sm:$0xff] %vm222_vm1, %v221_v24 }
 0x1f1   : > { %v237_v26 = vpop.xlane.xlu1 %236 }
 0x1f2   : > { %v238_v27 = vadd.f32 %v237_v26, %v230_v25 }
 0x1f4   : > { %239 = vst.msk [vmem:[#allocation4] sm:$0xff] %vm222_vm1, %v238_v27 }
 0x1f7   : > { %v245_v28 = vld [vmem:[#allocation3] sm:$0xff] }
 0x1f8   : > { %446 = vlog2.f32 %v245_v28 }
 0x1fb   : > { %v249_v35 = vld [vmem:[#allocation4] sm:$0xff] }
 0x202   : > { %v447_v31 = vpop.eup %446 }
 0x203   : > { %v247_v34 = vmul.f32 0.6931472, %v447_v31 }
 0x205   : > { %v248_v36 = vadd.f32 %v247_v34, %v244_v32 }
 0x207   : > { %v250_v37 = vsub.f32 %v248_v36, %v249_v35 }
 0x209   : > { %v257_v38 = vsel %vm256_vm3, %v250_v37, 0.0 }
 0x20a   : > { %258 = vst.msk [vmem:[%s694_s25] sm:$0xff] %vm222_vm1, %v257_v38 }
 0x20b PF: > { %s15_s16 = sadd.s32 1, %s544_s16   ;;  %s737_s9 = smov %s520_s10 }
 0x20c   : > { %p12_p12 = scmp.ge.s32.totalorder %s15_s16, 11   ;;  %s738_s10 = smov %s524_s11 }
 0x20d   : > { %s739_s11 = smov %s632_s29  ;;  %s740_s12 = smov %s536_s14 }
 0x20e   : > { %s741_s13 = smov %s540_s15  ;;  %s742_s14 = smov %s745_s18 }
 0x20f   : > { %s743_s15 = smov %s749_s19  ;;  %14 = sbr.rel (!%p12_p12) target bundleno = 5 (0x5), region = 79 }
 0x216   :  { %278 = vsyncpa [#allocation6], 1 }
 0x217   :  { %280 = vsyncpa [#allocation6 + $0x1], 1 }

</bundles_post_ra>
